<compile_context>
chip_gen: v7x
topology: tpu7x:2x2x1
jax: 0.10.0
libtpu: 0.0.40
codegen_flags: <defaults>
</compile_context>

<pallas_src>
import functools
import math

import jax
import jax.numpy as jnp
from jax.experimental import pallas as pl
from jax.experimental.pallas import tpu as pltpu

_EPS = 1e-5
_ROW_TILE_TARGET = 1024            # rows of (N*H*W) per grid step
_VMEM_LIMIT = 32 * 1024 * 1024     # explicit scoped-VMEM limit (v7x-safe)


def _row_tile(m, target=_ROW_TILE_TARGET):
    """Largest multiple-of-8 divisor of m that is <= target (>=128), else m."""
    if m <= target or m % 8:
        return m
    t = target - target % 8
    while t >= 128 and m % t:
        t -= 8
    return t if t >= 128 else m


def _imgs_per_block(n, hw, target_rows=_ROW_TILE_TARGET):
    """Images per grid step for the 3x3 kernel: largest divisor of n whose
    block fits the row target while keeping >= 2 grid steps when n >= 2 (so
    both v7x TensorCores stay busy)."""
    best = 1
    for d in range(1, n + 1):
        if n % d or d * hw > target_rows:
            continue
        if n >= 2 and n // d < 2:
            continue
        best = d
    return best


@functools.lru_cache(maxsize=None)
def _roll_matches_jnp_roll():
    """One-time on-device self-check of pltpu.roll's rotation convention.

    The 3x3 kernel assumes pltpu.roll == jnp.roll (element i moves to i+shift);
    if a backend ever used the opposite convention the shift sign is adapted
    instead of silently producing a spatially flipped convolution.  Must be
    warmed outside jit (prepare_params does this)."""
    def kern(x_ref, o_ref):
        o_ref[...] = pltpu.roll(x_ref[...], shift=1, axis=0)

    x = jnp.arange(8 * 128, dtype=jnp.float32).reshape(8, 128)
    out = pl.pallas_call(
        kern, out_shape=jax.ShapeDtypeStruct((8, 128), jnp.float32))(x)
    return bool(jnp.array_equal(out, jnp.roll(x, 1, axis=0)))


# ----------------------------------------------------------------------------
# Kernel 1: one-pass BatchNorm statistics of x -> per-channel (scale, shift)
#   bn(x) = x * scale + shift,  scale = gamma * rsqrt(var + eps),
#                               shift = beta - mean * scale
# ----------------------------------------------------------------------------
def _bn1_stats_kernel(x_ref, g_ref, b_ref, ss_ref, acc_ref, *, eps, inv_m):
    i = pl.program_id(0)

    @pl.when(i == 0)
    def _init():
        acc_ref[...] = jnp.zeros_like(acc_ref)

    x = x_ref[...].astype(jnp.float32)
    s = jnp.sum(x, axis=0, keepdims=True)
    sq = jnp.sum(x * x, axis=0, keepdims=True)
    row = jax.lax.broadcasted_iota(jnp.int32, (2, 1), 0)
    # Single full-tile accumulator update (row 0 = sum, row 1 = sum of squares).
    acc_ref[...] += jnp.where(row == 0, s, sq)

    @pl.when(i == pl.num_programs(0) - 1)
    def _finalize():
        mean = acc_ref[0:1, :] * inv_m
        var = acc_ref[1:2, :] * inv_m - mean * mean
        scale = g_ref[...] * jax.lax.rsqrt(var + eps)
        ss_ref[...] = jnp.where(row == 0, scale, b_ref[...] - mean * scale)


def bn_scale_shift(x2d, gamma2d, beta2d, *, eps=_EPS):
    m, c = x2d.shape
    tm = _row_tile(m)
    kern = functools.partial(_bn1_stats_kernel, eps=eps, inv_m=1.0 / m)
    return pl.pallas_call(
        kern,
        out_shape=jax.ShapeDtypeStruct((2, c), jnp.float32),
        grid=(m // tm,),
        in_specs=[pl.BlockSpec((tm, c), lambda i: (i, 0)),
                  pl.BlockSpec((1, c), lambda i: (0, 0)),
                  pl.BlockSpec((1, c), lambda i: (0, 0))],
        out_specs=pl.BlockSpec((2, c), lambda i: (0, 0)),
        scratch_shapes=[pltpu.VMEM((2, c), jnp.float32)],
        compiler_params=pltpu.CompilerParams(
            dimension_semantics=("arbitrary",),
            vmem_limit_bytes=_VMEM_LIMIT),
    )(x2d, gamma2d, beta2d)


# ----------------------------------------------------------------------------
# Kernel 2: fused BN1-apply + ReLU + grouped 1x1 conv (block-diagonal MXU
# matmul) + BN2 statistics in the epilogue -> y1 and ss2 in one pass over x.
# ----------------------------------------------------------------------------
def _bn_relu_conv1x1_stats_kernel(x_ref, ss1_ref, w_ref, g2_ref, b2_ref,
                                  y_ref, ss2_ref, acc_ref,
                                  *, eps, inv_m, mxu_dtype):
    i = pl.program_id(0)

    @pl.when(i == 0)
    def _init():
        acc_ref[...] = jnp.zeros_like(acc_ref)

    x = x_ref[...].astype(jnp.float32)
    xr = jnp.maximum(x * ss1_ref[0:1, :] + ss1_ref[1:2, :], 0.0)
    y = jnp.dot(xr.astype(mxu_dtype), w_ref[...],
                preferred_element_type=jnp.float32)
    y_ref[...] = y.astype(y_ref.dtype)

    # Fused BN2 statistics: no separate HBM pass over y1.
    row = jax.lax.broadcasted_iota(jnp.int32, (2, 1), 0)
    acc_ref[...] += jnp.where(row == 0,
                              jnp.sum(y, axis=0, keepdims=True),
                              jnp.sum(y * y, axis=0, keepdims=True))

    @pl.when(i == pl.num_programs(0) - 1)
    def _finalize():
        mean = acc_ref[0:1, :] * inv_m
        var = acc_ref[1:2, :] * inv_m - mean * mean
        scale = g2_ref[...] * jax.lax.rsqrt(var + eps)
        ss2_ref[...] = jnp.where(row == 0, scale, b2_ref[...] - mean * scale)


def bn_relu_conv1x1_stats(x2d, ss1, w1_dense, gamma2, beta2, *, eps=_EPS):
    m, cin = x2d.shape
    cmid = w1_dense.shape[1]
    tm = _row_tile(m)
    kern = functools.partial(_bn_relu_conv1x1_stats_kernel, eps=eps,
                             inv_m=1.0 / m, mxu_dtype=w1_dense.dtype)
    return pl.pallas_call(
        kern,
        out_shape=(jax.ShapeDtypeStruct((m, cmid), jnp.float32),
                   jax.ShapeDtypeStruct((2, cmid), jnp.float32)),
        grid=(m // tm,),
        in_specs=[pl.BlockSpec((tm, cin), lambda i: (i, 0)),
                  pl.BlockSpec((2, cin), lambda i: (0, 0)),
                  pl.BlockSpec((cin, cmid), lambda i: (0, 0)),
                  pl.BlockSpec((1, cmid), lambda i: (0, 0)),
                  pl.BlockSpec((1, cmid), lambda i: (0, 0))],
        out_specs=[pl.BlockSpec((tm, cmid), lambda i: (i, 0)),
                   pl.BlockSpec((2, cmid), lambda i: (0, 0))],
        scratch_shapes=[pltpu.VMEM((2, cmid), jnp.float32)],
        compiler_params=pltpu.CompilerParams(
            dimension_semantics=("arbitrary",),
            vmem_limit_bytes=_VMEM_LIMIT),
    )(x2d, ss1, w1_dense, gamma2, beta2)


# ----------------------------------------------------------------------------
# Kernel 3: fused BN2-apply + ReLU + grouped 3x3 conv (pad=1) + DenseNet concat
#   Blocks hold whole images.  The 3x3 conv is 9 shifted MXU matmuls; shifts
#   use pltpu.roll (XLU), boundary/wrap contributions are zeroed with per-row
#   column/row masks, so no halo scratch or misaligned sublane slice is needed.
# ----------------------------------------------------------------------------
def _bn_relu_conv3x3_concat_kernel(x_ref, y_ref, ss_ref, w_ref, o_ref,
                                   *, hh, ww, mxu_dtype, roll_like_jnp):
    rows, cmid = y_ref.shape
    cin = x_ref.shape[1]
    cout = w_ref.shape[2]
    hw = hh * ww

    # BN2 apply (precomputed scale/shift) + ReLU, f32 math on the VPU.
    yr = jnp.maximum(y_ref[...] * ss_ref[0:1, :] + ss_ref[1:2, :], 0.0)

    # Per-row image coordinates (blocks contain an integer number of images).
    r = jax.lax.broadcasted_iota(jnp.int32, (rows, 1), 0)
    col = r % ww
    irow = (r % hw) // ww

    acc = jnp.zeros((rows, cout), jnp.float32)
    for dy in (-1, 0, 1):
        for dx in (-1, 0, 1):
            shift = dy * ww + dx
            if shift:
                amt = ((-shift) % rows) if roll_like_jnp else (shift % rows)
                xs = pltpu.roll(yr, shift=amt, axis=0)
            else:
                xs = yr
            conds = []
            if dy == -1:
                conds.append(irow > 0)
            elif dy == 1:
                conds.append(irow < hh - 1)
            if dx == -1:
                conds.append(col > 0)
            elif dx == 1:
                conds.append(col < ww - 1)
            if conds:
                mask = conds[0]
                for c in conds[1:]:
                    mask = jnp.logical_and(mask, c)
                xs = jnp.where(mask, xs, 0.0)
            k = (dy + 1) * 3 + (dx + 1)
            acc = acc + jnp.dot(xs.astype(mxu_dtype), w_ref[k],
                                preferred_element_type=jnp.float32)
    # TODO(synk): optional im2col fusion of the 9 taps into one K=9*cmid matmul
    #             (verify with a bundle dump; at cout=8 the MXU is not binding).

    # DenseNet concat written straight into the output slab.  With
    # cin+growth < 128 lanes the stores are lane-masked either way; lane-dense
    # output would require padding the channel count (changes the module).
    o_ref[:, 0:cin] = x_ref[...].astype(o_ref.dtype)
    o_ref[:, cin:cin + cout] = acc.astype(o_ref.dtype)


def bn_relu_conv3x3_concat(x2d, y2d, ss2, w_taps, *, n, hh, ww):
    hw = hh * ww
    assert hw % 8 == 0, "H*W must be a multiple of 8 for the per-image blocks"
    m, cin = x2d.shape
    cmid = y2d.shape[1]
    cout = w_taps.shape[2]
    nb = _imgs_per_block(n, hw)
    rows = nb * hw
    kern = functools.partial(_bn_relu_conv3x3_concat_kernel, hh=hh, ww=ww,
                             mxu_dtype=w_taps.dtype,
                             roll_like_jnp=_roll_matches_jnp_roll())
    return pl.pallas_call(
        kern,
        out_shape=jax.ShapeDtypeStruct((m, cin + cout), x2d.dtype),
        grid=(n // nb,),
        in_specs=[pl.BlockSpec((rows, cin), lambda b: (b, 0)),
                  pl.BlockSpec((rows, cmid), lambda b: (b, 0)),
                  pl.BlockSpec((2, cmid), lambda b: (0, 0)),
                  pl.BlockSpec((9, cmid, cout), lambda b: (0, 0, 0))],
        out_specs=pl.BlockSpec((rows, cin + cout), lambda b: (b, 0)),
        compiler_params=pltpu.CompilerParams(
            dimension_semantics=("parallel",),
            vmem_limit_bytes=_VMEM_LIMIT),
    )(x2d, y2d, ss2, w_taps)


# ----------------------------------------------------------------------------
# One-time parameter re-packing (outside jit): PyTorch grouped-conv layout ->
# dense block-diagonal matrices in the MXU operand dtype.
# ----------------------------------------------------------------------------
def _dense_1x1_weight(w, groups, dtype):
    """(Cout, Cin//g, 1, 1) -> dense block-diagonal (Cin, Cout)."""
    cout, cig = w.shape[0], w.shape[1]
    cin, cog = cig * groups, cout // groups
    w2 = jnp.asarray(w, jnp.float32).reshape(cout, cig)
    dense = jnp.zeros((cin, cout), jnp.float32)
    for g in range(groups):
        blk = w2[g * cog:(g + 1) * cog, :].T                      # (cig, cog)
        dense = dense.at[g * cig:(g + 1) * cig, g * cog:(g + 1) * cog].set(blk)
    return dense.astype(dtype)


def _dense_3x3_weight(w, groups, dtype):
    """(Cout, Cin//g, 3, 3) -> per-tap dense block-diagonal (9, Cin, Cout)."""
    cout, cig = w.shape[0], w.shape[1]
    cin, cog = cig * groups, cout // groups
    w4 = jnp.asarray(w, jnp.float32)
    dense = jnp.zeros((9, cin, cout), jnp.float32)
    for g in range(groups):
        blk = w4[g * cog:(g + 1) * cog]                           # (cog, cig, 3, 3)
        blk = jnp.transpose(blk, (2, 3, 1, 0)).reshape(9, cig, cog)
        dense = dense.at[:, g * cig:(g + 1) * cig, g * cog:(g + 1) * cog].set(blk)
    return dense.astype(dtype)


def prepare_params(params, *, group_1x1, group_3x3, mxu_dtype=jnp.bfloat16):
    """Runs once at parameter-load time, outside jit (review item 11)."""
    _roll_matches_jnp_roll()   # warm the on-device roll-convention check
    cin = params['bn1_g'].shape[0]
    cmid = params['bn2_g'].shape[0]
    return {
        'bn1_g': params['bn1_g'].reshape(1, cin).astype(jnp.float32),
        'bn1_b': params['bn1_b'].reshape(1, cin).astype(jnp.float32),
        'bn2_g': params['bn2_g'].reshape(1, cmid).astype(jnp.float32),
        'bn2_b': params['bn2_b'].reshape(1, cmid).astype(jnp.float32),
        'w1': _dense_1x1_weight(params['w1'], group_1x1, mxu_dtype),
        'w2': _dense_3x3_weight(params['w2'], group_3x3, mxu_dtype),
    }


# ----------------------------------------------------------------------------
# _DenseLayer forward
# ----------------------------------------------------------------------------
def dense_layer_forward_nhwc(x_nhwc, prep):
    """Channels-last core: (N, H, W, Cin) -> (N, H, W, Cin + growth)."""
    n, hh, ww, cin = x_nhwc.shape
    m = n * hh * ww
    x2d = x_nhwc.reshape(m, cin)

    ss1 = bn_scale_shift(x2d, prep['bn1_g'], prep['bn1_b'])
    y1, ss2 = bn_relu_conv1x1_stats(x2d, ss1, prep['w1'],
                                    prep['bn2_g'], prep['bn2_b'])
    out2d = bn_relu_conv3x3_concat(x2d, y1, ss2, prep['w2'],
                                   n=n, hh=hh, ww=ww)
    return out2d.reshape(n, hh, ww, out2d.shape[1])


def dense_layer_forward(x_nchw, prep):
    """NCHW wrapper matching the PyTorch module.  Keep the surrounding network
    channels-last (use dense_layer_forward_nhwc) to avoid these transposes."""
    out = dense_layer_forward_nhwc(jnp.transpose(x_nchw, (0, 2, 3, 1)), prep)
    return jnp.transpose(out, (0, 3, 1, 2))


# ----------------------------------------------------------------------------
# Pure-JAX reference (training-mode batch-stat BN, same as a fresh PyTorch
# module's forward) for the correctness check.
# ----------------------------------------------------------------------------
def _reference_dense_layer(x, params, *, group_1x1, group_3x3, eps=_EPS):
    def bn_relu(v, gamma, beta):
        mean = jnp.mean(v, axis=(0, 2, 3), keepdims=True)
        var = jnp.mean(jnp.square(v - mean), axis=(0, 2, 3), keepdims=True)
        vn = (v - mean) * jax.lax.rsqrt(var + eps)
        vn = vn * gamma.reshape(1, -1, 1, 1) + beta.reshape(1, -1, 1, 1)
        return jnp.maximum(vn, 0.0)

    dn = ('NCHW', 'OIHW', 'NCHW')
    h = bn_relu(x, params['bn1_g'], params['bn1_b'])
    h = jax.lax.conv_general_dilated(h, params['w1'], (1, 1), 'VALID',
                                     feature_group_count=group_1x1,
                                     dimension_numbers=dn)
    h = bn_relu(h, params['bn2_g'], params['bn2_b'])
    h = jax.lax.conv_general_dilated(h, params['w2'], (1, 1), ((1, 1), (1, 1)),
                                     feature_group_count=group_3x3,
                                     dimension_numbers=dn)
    return jnp.concatenate([x, h], axis=1)


# ----------------------------------------------------------------------------
if __name__ == "__main__":
    # _DenseLayer(in_channels=16, growth_rate=8) with args.bottleneck=2,
    # args.group_1x1=2, args.group_3x3=2
    N, CIN, H, W = 2, 16, 16, 16
    GROWTH, BOTTLENECK, G1, G3 = 8, 2, 2, 2
    CMID = BOTTLENECK * GROWTH

    key = jax.random.PRNGKey(0)
    k_x, k_w1, k_w2, k_g1, k_b1, k_g2, k_b2 = jax.random.split(key, 7)
    params = {
        'bn1_g': 1.0 + 0.1 * jax.random.normal(k_g1, (CIN,), jnp.float32),
        'bn1_b': 0.1 * jax.random.normal(k_b1, (CIN,), jnp.float32),
        'w1': (math.sqrt(2.0 / CMID)
               * jax.random.normal(k_w1, (CMID, CIN // G1, 1, 1), jnp.float32)),
        'bn2_g': 1.0 + 0.1 * jax.random.normal(k_g2, (CMID,), jnp.float32),
        'bn2_b': 0.1 * jax.random.normal(k_b2, (CMID,), jnp.float32),
        'w2': (math.sqrt(2.0 / (9 * GROWTH))
               * jax.random.normal(k_w2, (GROWTH, CMID // G3, 3, 3), jnp.float32)),
    }
    x = jax.random.normal(k_x, (N, CIN, H, W), jnp.float32)

    ref = _reference_dense_layer(x, params, group_1x1=G1, group_3x3=G3)
    fwd = jax.jit(dense_layer_forward)

    # f32 MXU operands: strict check against the f32 reference.
    prep_f32 = prepare_params(params, group_1x1=G1, group_3x3=G3,
                              mxu_dtype=jnp.float32)
    out_f32 = fwd(x, prep_f32)
    jax.block_until_ready(out_f32)
    assert out_f32.shape == (N, CIN + GROWTH, H, W)
    assert bool(jnp.all(jnp.isfinite(out_f32)))
    err_f32 = float(jnp.max(jnp.abs(out_f32 - ref)))
    assert err_f32 < 2e-2, f"f32 path mismatch vs reference: {err_f32}"

    # bf16 MXU operands (the fast path on v6e/v7x, f32 accumulation): looser
    # tolerance to account for bf16 operand rounding only.
    prep_bf16 = prepare_params(params, group_1x1=G1, group_3x3=G3,
                               mxu_dtype=jnp.bfloat16)
    out_bf16 = fwd(x, prep_bf16)
    jax.block_until_ready(out_bf16)
    err_bf16 = float(jnp.max(jnp.abs(out_bf16 - ref)))
    assert err_bf16 < 1e-1, f"bf16 path mismatch vs reference: {err_bf16}"

    print("KERNEL_OK")
</pallas_src>

<mosaic_0001>
module attributes {stable_mosaic.version = 11 : i64} {
  func.func @kern(%arg0: memref<8x128xf32, #tpu.memory_space<vmem>>, %arg1: memref<8x128xf32, #tpu.memory_space<vmem>>) attributes {dimension_semantics = [], scalar_prefetch = 0 : i64, scratch_operands = 0 : i64, tpu.core_type = #tpu.core_type<tc>} {
    %c0 = arith.constant 0 : index
    %c0_0 = arith.constant 0 : index
    %0 = vector.load %arg0[%c0, %c0_0] : memref<8x128xf32, #tpu.memory_space<vmem>>, vector<8x128xf32>
    %c1_i32 = arith.constant 1 : i32
    %1 = tpu.dynamic_rotate %0 by %c1_i32 dim 0 : vector<8x128xf32>, i32 -> vector<8x128xf32>
    %c0_1 = arith.constant 0 : index
    %c0_2 = arith.constant 0 : index
    %2 = vector.load %arg1[%c0_1, %c0_2] : memref<8x128xf32, #tpu.memory_space<vmem>>, vector<8x128xf32>
    tpu.vector_store %arg1[%c0_1, %c0_2], %1 {strides = array<i32>} : memref<8x128xf32, #tpu.memory_space<vmem>>, vector<8x128xf32>,
    return
  }
}

</mosaic_0001>

<bundles_post_ra>
// kernel: tpu_custom_call.1
= control target key start
LH: loop header
LB: loop body
LE: loop exit
PB: predicated region body
PF: predicated region fallthrough
CT: control target
= control target key end

     0   :  { %6 = vsyncpa [#allocation3], 0  ;;  %s125_s0 = inlined_call_operand.hbm [shape: f32[8,128], index: 0, kind: input, shape index: {}]   ;;  %s126_s1 = inlined_call_operand.hbm [shape: f32[8,128], index: 1, kind: output, shape index: {}]  }
   0x1   :  { %7 = vsyncpa [#allocation4], 0  ;;  %s89_s6 = smov [#allocation2]   ;;  %s41_s10 = scalar_lea.hbm %s125_s0, 128 }
   0x2   :  { %s14_s7 = sshll.u32 %s89_s6, 4  ;;  %p42_p0 = scmp.ne.s32.totalorder %s125_s0, %s41_s10  ;;  %s15_s7 = int_to_ptr.vmem [resolvable:$true] %s14_s7 }
   0x3   :  { %p45_p1 = scmp.lt.u32.totalorder %s41_s10, %s125_s0 }
   0x5   :  { %p47_p2 = pnand %p45_p1, %p42_p0 }
   0x7   :  { %50 = shalt.err (!%p47_p2)
}
   0x8   :  { %s51_s15 = scalar_lea.vmem %s15_s7, 128  ;;  %p56_p4 = scmp.lt.s32.totalorder %s15_s7, %s15_s7 }
   0x9   :  { %p52_p3 = scmp.ne.s32.totalorder %s15_s7, %s51_s15  ;;  %p57_p5 = scmp.lt.s32.totalorder %s51_s15, %s51_s15 }
   0xb   :  { %p58_p6 = por %p57_p5, %p56_p4 }
   0xd   :  { %p59_p7 = pnand %p58_p6, %p52_p3 }
   0xf   :  { %62 = shalt.err (!%p59_p7)
}
  0x10   :  { %17 = dma.hbm_to_vmem [thread:$0]  %s125_s0, 128, %s15_s7, [#allocation3]  }
  0x11   :  { %85 = dma.done.wait [#allocation3], 128  }
  0x12   :  { %86 = vsyncadd [#allocation3], 4294967168  ;;  %s90_s18 = smov [#allocation5]   ;;  %v21_v0 = vld [vmem:[#allocation2] sm:$0xff] }
  0x13   :  { %s30_s19 = sshll.u32 %s90_s18, 4  ;;  %v22_v1 = vrot.slane %v21_v0, 7  ;;  %s31_s19 = int_to_ptr.vmem [resolvable:$true] %s30_s19 }
  0x14   :  { %s63_s20 = scalar_lea.vmem %s31_s19, 128  ;;  %p68_p9 = scmp.lt.s32.totalorder %s31_s19, %s31_s19 }
  0x15   :  { %23 = vst [vmem:[#allocation5] sm:$0xff] %v22_v1  ;;  %p64_p8 = scmp.ne.s32.totalorder %s31_s19, %s63_s20  ;;  %p69_p10 = scmp.lt.s32.totalorder %s63_s20, %s63_s20 }
  0x17   :  { %p70_p11 = por %p69_p10, %p68_p9 }
  0x19   :  { %p71_p12 = pnand %p70_p11, %p64_p8 }
  0x1b   :  { %74 = shalt.err (!%p71_p12)
}
  0x1c   :  { %s75_s23 = scalar_lea.hbm %s126_s1, 128 }
  0x1d   :  { %p76_p13 = scmp.ne.s32.totalorder %s126_s1, %s75_s23  ;;  %p79_p0 = scmp.lt.u32.totalorder %s75_s23, %s126_s1 }
  0x1f   :  { %p81_p1 = pnand %p79_p0, %p76_p13 }
  0x21   :  { %84 = shalt.err (!%p81_p1)
}
  0x22   :  { %33 = dma.vmem_to_hbm [thread:$0]  %s31_s19, 128, %s126_s1, [#allocation4]  }
  0x23   :  { %87 = dma.done.wait [#allocation4], 128  }
  0x24   :  { %88 = vsyncadd [#allocation4], 4294967168 }
  0x25   :  { %37 = vsyncpa [#allocation3], 1 }
  0x26   :  { %38 = vsyncpa [#allocation4], 1 }

</bundles_post_ra>
